<compile_context>
chip_gen: v5e
topology: v5e:2x2
jax: 0.10.0
libtpu: 0.0.40
codegen_flags: <defaults>
</compile_context>

<pallas_src>
import functools

import jax
import jax.numpy as jnp
from jax import lax
from jax.experimental import pallas as pl
from jax.experimental.pallas import tpu as pltpu

MARGIN = 2.0
EPS = 1e-6  # torch.nn.functional.pairwise_distance default eps


def _contrastive_loss_kernel(o1_ref, o2_ref, label_ref, out_ref, *,
                             margin, batch, use_mxu_rowsum):
    tb = o1_ref.shape[0]

    # Subtract in the streamed dtype (bf16 VPU on v6e/v7x), upcast once, add eps
    # in f32.  Matches torch: ||x1 - x2 + eps||_2 along the feature dim.
    diff = (o1_ref[...] - o2_ref[...]).astype(jnp.float32) + EPS      # (TB, D)
    sq = diff * diff                                                  # (TB, D)

    if use_mxu_rowsum:
        # Row-sum on the otherwise-idle MXU (dot with a ones vector): keeps the
        # VALU/XLU slots free on the narrow-dtype path (matters most on v7x).
        ones = jnp.ones((sq.shape[1], 1), jnp.float32)
        sq_sum = lax.dot_general(sq, ones, (((1,), (0,)), ((), ())),
                                 preferred_element_type=jnp.float32)  # (TB, 1)
    else:
        sq_sum = jnp.sum(sq, axis=-1, keepdims=True)                  # (TB, 1)

    dist = jnp.sqrt(sq_sum)                                           # (TB, 1)
    label = label_ref[...]                                            # (TB, 1) f32
    hinge = jnp.maximum(margin - dist, 0.0)
    per_row = (1.0 - label) * sq_sum + label * (hinge * hinge)        # (TB, 1)

    # Ragged last tile: out-of-range rows of a boundary block hold unspecified
    # data, so mask them out before the in-tile reduction.
    row = pl.program_id(0) * tb + lax.broadcasted_iota(jnp.int32, (tb, 1), 0)
    per_row = jnp.where(row < batch, per_row, 0.0)

    tile_sum = jnp.sum(per_row)                                       # scalar

    # Lane-dense (8, 128) output block: partial sum at [0, 0], exact zeros
    # elsewhere -> unmasked vector stores; summing the whole buffer in the
    # wrapper is exactly the sum of the per-tile sums.
    sub = lax.broadcasted_iota(jnp.int32, (8, 128), 0)
    lane = lax.broadcasted_iota(jnp.int32, (8, 128), 1)
    out_ref[...] = jnp.where((sub == 0) & (lane == 0), tile_sum, 0.0)


def _round_up(x, m):
    return ((x + m - 1) // m) * m


def _choose_block_rows(B, D, itemsize):
    """Batch-tile rows: ~1-2 MiB per pipelined input buffer, with the in-kernel
    f32 temporaries (diff/sq/upcast) counted in the same budget, well under the
    32 MiB scoped-VMEM limit (which also holds on v7x's 64 MiB VMEM)."""
    sub = 16 if itemsize < 4 else 8            # sublane packing (bf16 vs f32)
    # Per tile-row VMEM bytes: 2 feature inputs x 2 pipeline buffers (streamed
    # dtype) + ~3 f32-sized temporaries materialized by Mosaic, + small slivers.
    bytes_per_row = D * (4 * itemsize + 3 * 4) + 16
    budget_bytes = 8 * 1024 * 1024
    tb = max(sub, (budget_bytes // bytes_per_row) // sub * sub)
    # v7x megacore: keep >= 2 grid steps when the batch allows it, so the
    # "parallel" axis actually shards across both TensorCores.
    if B > sub:
        tb = min(tb, _round_up(pl.cdiv(B, 2), sub))
    return tb


def contrastive_loss(output1, output2, label, *, margin=MARGIN, block_rows=None):
    """output1, output2: (B, D) (f32 or bf16); label: (B,) or (B, 1). Scalar loss."""
    B, D = output1.shape
    label = jnp.reshape(label, (B, 1)).astype(jnp.float32)

    itemsize = jnp.dtype(output1.dtype).itemsize
    sublane = 16 if itemsize < 4 else 8
    if block_rows is None:
        tb = _choose_block_rows(B, D, itemsize)
    else:
        tb = _round_up(int(block_rows), sublane)
    tb = min(tb, B)                      # full-batch block is allowed when tb >= B
    num_tiles = pl.cdiv(B, tb)

    # MXU row-sum only where it is both useful and exactly lane-aligned.
    use_mxu_rowsum = (itemsize < 4) and (D % 128 == 0)

    partial = pl.pallas_call(
        functools.partial(_contrastive_loss_kernel, margin=float(margin),
                          batch=B, use_mxu_rowsum=use_mxu_rowsum),
        out_shape=jax.ShapeDtypeStruct((num_tiles * 8, 128), jnp.float32),
        grid=(num_tiles,),
        in_specs=[
            pl.BlockSpec((tb, D), lambda i: (i, 0)),
            pl.BlockSpec((tb, D), lambda i: (i, 0)),
            pl.BlockSpec((tb, 1), lambda i: (i, 0)),
        ],
        out_specs=pl.BlockSpec((8, 128), lambda i: (i, 0)),
        compiler_params=pltpu.CompilerParams(
            dimension_semantics=("parallel",),
            vmem_limit_bytes=32 * 1024 * 1024,
        ),
    )(output1, output2, label)

    # Everything except each tile's [0, 0] slot is an exact zero, so this equals
    # the sum of the per-tile partial sums; torch.mean == sum / B.
    return jnp.sum(partial) / B


def _reference(output1, output2, label):
    # Pure-JAX reference mirroring the PyTorch module.
    label = jnp.reshape(label, (-1, 1)).astype(jnp.float32)
    diff = output1.astype(jnp.float32) - output2.astype(jnp.float32) + EPS
    dist = jnp.sqrt(jnp.sum(diff * diff, axis=-1, keepdims=True))
    per_pair = (1.0 - label) * jnp.square(dist) + label * jnp.square(
        jnp.maximum(MARGIN - dist, 0.0)
    )
    return jnp.mean(per_pair)


if __name__ == "__main__":
    # Case 1: small siamese embedding batch (single tile; jnp.sum reduction path).
    B, D = 8, 32
    k1, k2, k3 = jax.random.split(jax.random.PRNGKey(0), 3)
    o1 = jax.random.normal(k1, (B, D), dtype=jnp.float32)
    o2 = jax.random.normal(k2, (B, D), dtype=jnp.float32)
    lbl = jax.random.bernoulli(k3, 0.5, (B, 1)).astype(jnp.float32)

    loss = contrastive_loss(o1, o2, lbl)
    jax.block_until_ready(loss)
    ref = _reference(o1, o2, lbl)
    assert jnp.allclose(loss, ref, rtol=1e-5, atol=1e-5), (loss, ref)

    # Case 2: forced multi-tile with a ragged last tile (B % TB != 0).
    B2, D2 = 20, 128
    k4, k5, k6 = jax.random.split(jax.random.PRNGKey(0), 3)
    o1b = jax.random.normal(k4, (B2, D2), dtype=jnp.float32)
    o2b = jax.random.normal(k5, (B2, D2), dtype=jnp.float32)
    lblb = jax.random.bernoulli(k6, 0.5, (B2, 1)).astype(jnp.float32)

    loss2 = contrastive_loss(o1b, o2b, lblb, block_rows=8)
    jax.block_until_ready(loss2)
    ref2 = _reference(o1b, o2b, lblb)
    assert jnp.allclose(loss2, ref2, rtol=1e-5, atol=1e-5), (loss2, ref2)

    # Case 2b: default (auto) tiling -- megacore cap keeps >= 2 grid steps.
    loss2b = contrastive_loss(o1b, o2b, lblb)
    jax.block_until_ready(loss2b)
    assert jnp.allclose(loss2b, ref2, rtol=1e-5, atol=1e-5), (loss2b, ref2)

    # Case 3: bf16 features (bf16 subtraction + MXU row-sum path), ragged tile.
    o1h = o1b.astype(jnp.bfloat16)
    o2h = o2b.astype(jnp.bfloat16)
    loss3 = contrastive_loss(o1h, o2h, lblb)
    jax.block_until_ready(loss3)
    ref3 = _reference(o1h, o2h, lblb)
    assert jnp.allclose(loss3, ref3, rtol=1e-2, atol=1e-2), (loss3, ref3)

    print("KERNEL_OK")
</pallas_src>

<mosaic_0001>
module attributes {stable_mosaic.version = 11 : i64} {
  func.func @_contrastive_loss_kernel(%arg0: i32, %arg1: memref<8x32xf32, #tpu.memory_space<vmem>>, %arg2: memref<8x32xf32, #tpu.memory_space<vmem>>, %arg3: memref<8x1xf32, #tpu.memory_space<vmem>>, %arg4: memref<8x128xf32, #tpu.memory_space<vmem>>) attributes {dimension_semantics = [#tpu.dimension_semantics<parallel>], iteration_bounds = array<i64: 1>, scalar_prefetch = 0 : i64, scratch_operands = 0 : i64, tpu.core_type = #tpu.core_type<tc>, window_params = [{transform_indices = @transform_0, window_bounds = array<i64: 8, 32>}, {transform_indices = @transform_1, window_bounds = array<i64: 8, 32>}, {transform_indices = @transform_2, window_bounds = array<i64: 8, 1>}, {transform_indices = @transform_3, window_bounds = array<i64: 8, 128>}]} {
    %c0 = arith.constant 0 : index
    %c0_0 = arith.constant 0 : index
    %0 = vector.load %arg1[%c0, %c0_0] : memref<8x32xf32, #tpu.memory_space<vmem>>, vector<8x32xf32>
    %c0_1 = arith.constant 0 : index
    %c0_2 = arith.constant 0 : index
    %1 = vector.load %arg2[%c0_1, %c0_2] : memref<8x32xf32, #tpu.memory_space<vmem>>, vector<8x32xf32>
    %2 = arith.subf %0, %1 : vector<8x32xf32>
    %cst = arith.constant 9.99999997E-7 : f32
    %3 = vector.broadcast %cst : f32 to vector<8x32xf32>
    %4 = arith.addf %2, %3 : vector<8x32xf32>
    %5 = arith.mulf %4, %4 : vector<8x32xf32>
    %cst_3 = arith.constant dense<0.000000e+00> : vector<8xf32>
    %6 = vector.multi_reduction <add>, %5, %cst_3 [1] : vector<8x32xf32> to vector<8xf32>
    %7 = vector.shape_cast %6 : vector<8xf32> to vector<8x1xf32>
    %8 = math.sqrt %7 : vector<8x1xf32>
    %c0_4 = arith.constant 0 : index
    %c0_5 = arith.constant 0 : index
    %9 = vector.load %arg3[%c0_4, %c0_5] : memref<8x1xf32, #tpu.memory_space<vmem>>, vector<8x1xf32>
    %cst_6 = arith.constant 2.000000e+00 : f32
    %10 = vector.broadcast %cst_6 : f32 to vector<8x1xf32>
    %11 = arith.subf %10, %8 : vector<8x1xf32>
    %cst_7 = arith.constant 0.000000e+00 : f32
    %12 = vector.broadcast %cst_7 : f32 to vector<8x1xf32>
    %13 = arith.maximumf %11, %12 : vector<8x1xf32>
    %cst_8 = arith.constant 1.000000e+00 : f32
    %14 = vector.broadcast %cst_8 : f32 to vector<8x1xf32>
    %15 = arith.subf %14, %9 : vector<8x1xf32>
    %16 = arith.mulf %15, %7 : vector<8x1xf32>
    %17 = arith.mulf %13, %13 : vector<8x1xf32>
    %18 = arith.mulf %9, %17 : vector<8x1xf32>
    %19 = arith.addf %16, %18 : vector<8x1xf32>
    %c8_i32 = arith.constant 8 : i32
    %20 = arith.muli %arg0, %c8_i32 : i32
    %21 = tpu.iota {dimensions = array<i32: 0>} : vector<8x1xi32>
    %22 = vector.broadcast %20 : i32 to vector<8x1xi32>
    %23 = arith.addi %22, %21 : vector<8x1xi32>
    %c8_i32_9 = arith.constant 8 : i32
    %24 = vector.broadcast %c8_i32_9 : i32 to vector<8x1xi32>
    %25 = arith.cmpi slt, %23, %24 : vector<8x1xi32>
    %cst_10 = arith.constant 0.000000e+00 : f32
    %26 = vector.broadcast %cst_10 : f32 to vector<8x1xf32>
    %27 = arith.select %25, %19, %26 : vector<8x1xi1>, vector<8x1xf32>
    %28 = vector.shape_cast %27 : vector<8x1xf32> to vector<1x8x1xf32>
    %cst_11 = arith.constant dense<0.000000e+00> : vector<1xf32>
    %29 = vector.multi_reduction <add>, %28, %cst_11 [1, 2] : vector<1x8x1xf32> to vector<1xf32>
    %30 = vector.shape_cast %29 : vector<1xf32> to vector<1x1x1xf32>
    %31 = vector.extract %30[0, 0, 0] : f32 from vector<1x1x1xf32>
    %32 = tpu.iota {dimensions = array<i32: 0>} : vector<8x128xi32>
    %33 = tpu.iota {dimensions = array<i32: 1>} : vector<8x128xi32>
    %c0_i32 = arith.constant 0 : i32
    %34 = vector.broadcast %c0_i32 : i32 to vector<8x128xi32>
    %35 = arith.cmpi eq, %32, %34 : vector<8x128xi32>
    %c0_i32_12 = arith.constant 0 : i32
    %36 = vector.broadcast %c0_i32_12 : i32 to vector<8x128xi32>
    %37 = arith.cmpi eq, %33, %36 : vector<8x128xi32>
    %38 = arith.andi %35, %37 : vector<8x128xi1>
    %cst_13 = arith.constant 0.000000e+00 : f32
    %39 = vector.broadcast %31 : f32 to vector<8x128xf32>
    %40 = vector.broadcast %cst_13 : f32 to vector<8x128xf32>
    %41 = arith.select %38, %39, %40 : vector<8x128xi1>, vector<8x128xf32>
    %c0_14 = arith.constant 0 : index
    %c0_15 = arith.constant 0 : index
    %42 = vector.load %arg4[%c0_14, %c0_15] : memref<8x128xf32, #tpu.memory_space<vmem>>, vector<8x128xf32>
    tpu.vector_store %arg4[%c0_14, %c0_15], %41 {strides = array<i32>} : memref<8x128xf32, #tpu.memory_space<vmem>>, vector<8x128xf32>,
    return
  }
  func.func @transform_0(%arg0: i32) -> (i32, i32) {
    %c0_i32 = arith.constant 0 : i32
    %c0_i32_0 = arith.constant 0 : i32
    return %arg0, %c0_i32 : i32, i32
  }
  func.func @transform_1(%arg0: i32) -> (i32, i32) {
    %c0_i32 = arith.constant 0 : i32
    %c0_i32_0 = arith.constant 0 : i32
    return %arg0, %c0_i32 : i32, i32
  }
  func.func @transform_2(%arg0: i32) -> (i32, i32) {
    %c0_i32 = arith.constant 0 : i32
    %c0_i32_0 = arith.constant 0 : i32
    return %arg0, %c0_i32 : i32, i32
  }
  func.func @transform_3(%arg0: i32) -> (i32, i32) {
    %c0_i32 = arith.constant 0 : i32
    %c0_i32_0 = arith.constant 0 : i32
    return %arg0, %c0_i32 : i32, i32
  }
}

</mosaic_0001>

<bundles_post_ra>
// kernel: tpu_custom_call.1
= control target key start
LH: loop header
LB: loop body
LE: loop exit
PB: predicated region body
PF: predicated region fallthrough
CT: control target
= control target key end

     0   :  { %8 = vsyncpa [#allocation3], 0  ;;  %s193_s0 = inlined_call_operand.vmem [shape: f32[8,32], index: 0, kind: input, shape index: {}]   ;;  %s194_s1 = inlined_call_operand.hbm [shape: f32[8,32], index: 1, kind: input, shape index: {}]   ;;  %s195_s2 = inlined_call_operand.vmem [shape: f32[8,1], index: 2, kind: input, shape index: {}]   ;;  %s196_s3 = inlined_call_operand.hbm [shape: f32[8,128], index: 3, kind: output, shape index: {}]  }
   0x1   :  { %9 = vsyncpa [#allocation4], 0  ;;  %s17_s14 = sshll.u32 %s194_s1, 4  ;;  %s159_s15 = smov [#allocation2]   ;;  %s18_s14 = int_to_ptr.hbm [resolvable:$true] %s17_s14 }
   0x2   :  { %s19_s16 = sshll.u32 %s159_s15, 4  ;;  %s20_s16 = int_to_ptr.vmem [resolvable:$true] %s19_s16 }
   0x3   :  { %22 = dma.hbm_to_vmem [thread:$0]  %s18_s14, 128, %s20_s16, [#allocation3]  }
   0x4   :  { %155 = dma.done.wait [#allocation3], 128  }
   0x5   :  { %156 = vsyncadd [#allocation3], 4294967168  ;;  %v29_v0 = vld [vmem:[%s193_s0] sm:$0xff]  ;;  %vm34_vm0 = vcmask 261120   ;;  %vm65_vm3 = vcmask 7168   ;;  %v59_v33 = vlaneseq  ;;  %s91_s22 = sshll.u32 %s196_s3, 4  ;;  %s92_s22 = int_to_ptr.hbm [resolvable:$true] %s91_s22 }
   0x6   :  { %v30_v1 = vld [vmem:[#allocation2] sm:$0xff] }
   0x7   :  { %v31_v2 = vsub.f32 %v29_v0, %v30_v1  ;;  %v50_v17 = vld [vmem:[%s195_s2] sm:$0xff]  ;;  %v60_v34 = vshrl.u32 %v59_v33, 7  ;;  %v77_v35 = vand.u32 127, %v59_v33  ;;  %s160_s2 = smov [#allocation5]  }
   0x8   :  { %v53_v20 = vsub.f32 1.0, %v50_v17  ;;  %s89_s19 = sshll.u32 %s160_s2, 4  ;;  %s90_s19 = int_to_ptr.vmem [resolvable:$true] %s89_s19 }
   0x9   :  { %v32_v3 = vadd.f32 1e-06, %v31_v2  ;;  %vm78_vm4 = vcmp.eq.s32.totalorder %v60_v34, 0  ;;  %vm79_vm5 = vcmp.eq.s32.totalorder %v77_v35, 0 }
   0xa   :  { %vm80_vm6 = vmand %vm78_vm4, %vm79_vm5 }
   0xb   :  { %v33_v4 = vmul.f32 %v32_v3, %v32_v3 }
   0xd   :  { %v35_v5 = vsel %vm34_vm0, %v33_v4, 0.0 }
   0xe   :  { %36 = vadd.xlane.f32.xlu0 %v35_v5 }
  0x81   :  { %v37_v6 = vpop.xlane.xlu0 %36 }
  0x82   :  { %105 = vrsqrt.f32 %v37_v6  ;;  %vm45_vm1 = vcmp.eq.f32.partialorder %v37_v6, inf  ;;  %v48_v14 = vand.u32 2147483648, %v37_v6  ;;  %vm47_vm2 = vcmp.eq.f32.partialorder %v37_v6, 0.0 }
  0x83   :  { %v54_v22 = vmul.f32 %v53_v20, %v37_v6 }
  0x88   :  { %v106_v7 = vpop.eup %105 }
  0x89   :  { %v39_v8 = vmul.f32 %v106_v7, %v37_v6 }
  0x8b   :  { %v40_v9 = vmul.f32 %v106_v7, %v39_v8 }
  0x8d   :  { %v41_v10 = vmul.f32 0.5, %v40_v9 }
  0x8f   :  { %v42_v11 = vsub.f32 1.5, %v41_v10 }
  0x91   :  { %v43_v12 = vmul.f32 %v106_v7, %v42_v11 }
  0x93   :  { %v44_v13 = vmul.f32 %v43_v12, %v37_v6 }
  0x95   :  { %v46_v15 = vsel %vm45_vm1, %v37_v6, %v44_v13 }
  0x96   :  { %v49_v16 = vsel %vm47_vm2, %v48_v14, %v46_v15 }
  0x97   :  { %v51_v18 = vsub.f32 2.0, %v49_v16 }
  0x99   :  { %v52_v19 = vmax.f32 %v51_v18, 0.0 }
  0x9b   :  { %v55_v21 = vmul.f32 %v52_v19, %v52_v19 }
  0x9d   :  { %v56_v23 = vmul.f32 %v55_v21, %v50_v17 }
  0x9f   :  { %v57_v24 = vadd.f32 %v56_v23, %v54_v22 }
  0xa1   :  { %v66_v25 = vsel %vm65_vm3, %v57_v24, 0.0 }
  0xa2   :  { %67 = vadd.xlane.f32.xlu0 %v66_v25 }
 0x115   :  { %v68_v26 = vpop.xlane.xlu0 %67 }
 0x116   :  { %v69_v27 = vrot.slane %v68_v26, 4 }
 0x118   :  { %v70_v28 = vadd.f32 %v69_v27, %v68_v26 }
 0x11a   :  { %v71_v29 = vrot.slane %v70_v28, 2 }
 0x11c   :  { %v72_v30 = vadd.f32 %v71_v29, %v70_v28 }
 0x11e   :  { %v73_v31 = vrot.slane %v72_v30, 1 }
 0x120   :  { %v74_v32 = vadd.f32 %v73_v31, %v72_v30 }
 0x122   :  { %101 = vpush %v74_v32 }
 0x153   :  { %s102_s23 = spop %101 }
 0x154   :  { %v81_v36 = vstv %s102_s23 }
 0x155   :  { %v82_v37 = vsel %vm80_vm6, %v81_v36, 0.0 }
 0x156   :  { %83 = vst [vmem:[#allocation5] sm:$0xff] %v82_v37 }
 0x157   :  { %94 = dma.vmem_to_hbm [thread:$0]  %s90_s19, 128, %s92_s22, [#allocation4]  }
 0x158   :  { %157 = dma.done.wait [#allocation4], 128  }
 0x159   :  { %158 = vsyncadd [#allocation4], 4294967168 }
 0x15a   :  { %99 = vsyncpa [#allocation3], 1 }
 0x15b   :  { %100 = vsyncpa [#allocation4], 1 }

</bundles_post_ra>
